<compile_context>
chip_gen: v7x
topology: tpu7x:2x2x1
jax: 0.10.0
libtpu: 0.0.40
codegen_flags: <defaults>
</compile_context>

<pallas_src>
import math

import jax
import jax.numpy as jnp
from jax.experimental import pallas as pl
from jax.experimental.pallas import tpu as pltpu


def _make_se_kernel(true_hw: int, chunk: int):
    inv_hw = 1.0 / float(true_hw)

    def kernel(x_ref, w1_ref, b1_ref, w2_ref, b2_ref, o_ref):
        # x_ref : (1, C, HWp)  one batch's activations (native dtype)
        # w1_ref: (R, C)       nn.Linear(C, R).weight (PyTorch layout)
        # b1_ref: (R, 1)
        # w2_ref: (C, R)       nn.Linear(R, C).weight (PyTorch layout)
        # b2_ref: (C, 1)
        # o_ref : (1, C, HWp)
        x = x_ref[0]                                    # (C, HWp), native dtype
        hwp = x.shape[-1]
        n_chunks = hwp // chunk

        # AdaptiveAvgPool2d(1): chunked VPU accumulation in f32, then one
        # cross-lane reduce. Padded lanes are zero so they don't affect the
        # sum; divisor is the true H*W.
        acc = x[:, 0:chunk].astype(jnp.float32)         # (C, chunk)
        for i in range(1, n_chunks):
            acc = acc + x[:, i * chunk:(i + 1) * chunk].astype(jnp.float32)
        y = jnp.sum(acc, axis=-1, keepdims=True) * jnp.float32(inv_hw)  # (C, 1)

        # fc: Linear(C->R) + LeakyReLU(0.2) + Linear(R->C) + Sigmoid.
        # Column-vector form (W @ y) keeps channels on the sublane axis.
        h = jnp.dot(w1_ref[...], y, preferred_element_type=jnp.float32) + b1_ref[...]
        h = jnp.where(h >= 0, h, 0.2 * h)               # LeakyReLU(0.2)
        s = jnp.dot(w2_ref[...], h, preferred_element_type=jnp.float32) + b2_ref[...]
        s = jax.nn.sigmoid(s)                           # (C, 1) channel gates

        # x * gate, in the input dtype (no full-tile f32 upcast).
        o_ref[0] = x * s.astype(x.dtype)

    return kernel


def se_block(x, w1, b1, w2, b2):
    """SEBlock forward.

    x : (B, C, H, W) NCHW;  w1: (R, C), b1: (R,);  w2: (C, R), b2: (C,).
    """
    B, C, H, W = x.shape
    R = w1.shape[0]
    HW = H * W
    HWp = ((HW + 127) // 128) * 128                     # lane-dense last dim

    x3 = x.reshape(B, C, HW)
    if HWp != HW:
        x3 = jnp.pad(x3, ((0, 0), (0, 0), (0, HWp - HW)))   # zero pad

    itemsize = jnp.dtype(x.dtype).itemsize
    slab = C * HWp * itemsize                           # one batch's in/out block
    # 2x double-buffered input slab + 2x output slab + weights + headroom,
    # capped at a cross-generation-safe 64 MiB (v7x physical VMEM).
    vmem_limit = int(min(64 * 1024 * 1024,
                         max(32 * 1024 * 1024, 4 * slab + (2 << 20))))

    chunk = math.gcd(HWp, 512)                          # 128 / 256 / 512, divides HWp

    cost = pl.CostEstimate(
        flops=int(B * (4 * C * R + 2 * C * HW)),
        transcendentals=int(B * C),
        bytes_accessed=int(2 * B * C * HWp * itemsize),
    )

    out = pl.pallas_call(
        _make_se_kernel(HW, chunk),
        out_shape=jax.ShapeDtypeStruct((B, C, HWp), x.dtype),
        grid=(B,),
        in_specs=[
            pl.BlockSpec((1, C, HWp), lambda b: (b, 0, 0)),  # x: per-batch slab
            pl.BlockSpec((R, C), lambda b: (0, 0)),          # w1: VMEM-resident
            pl.BlockSpec((R, 1), lambda b: (0, 0)),          # b1
            pl.BlockSpec((C, R), lambda b: (0, 0)),          # w2
            pl.BlockSpec((C, 1), lambda b: (0, 0)),          # b2
        ],
        out_specs=pl.BlockSpec((1, C, HWp), lambda b: (b, 0, 0)),
        compiler_params=pltpu.CompilerParams(
            dimension_semantics=("parallel",),  # shard batch across TCs (v7x)
            vmem_limit_bytes=vmem_limit,
        ),
        cost_estimate=cost,
    )(x3, w1, b1.reshape(R, 1), w2, b2.reshape(C, 1))

    if HWp != HW:
        out = out[:, :, :HW]
    return out.reshape(B, C, H, W)


def se_block_ref(x, w1, b1, w2, b2):
    """Pure-JAX reference matching the PyTorch forward."""
    y = jnp.mean(x, axis=(2, 3))                        # (B, C)
    h = y @ w1.T + b1
    h = jnp.where(h >= 0, h, 0.2 * h)
    s = jax.nn.sigmoid(h @ w2.T + b2)                   # (B, C)
    return x * s[:, :, None, None]


if __name__ == "__main__":
    # Module config: SEBlock(input_dim=4, reduction=2)
    B, C, H, W = 2, 4, 16, 16
    R = 2

    key = jax.random.PRNGKey(0)
    kx, k1, k2, k3, k4 = jax.random.split(key, 5)

    x = jax.random.normal(kx, (B, C, H, W), dtype=jnp.float32)
    w1 = 0.1 * jax.random.normal(k1, (R, C), dtype=jnp.float32)   # Linear(C -> R).weight
    b1 = 0.1 * jax.random.normal(k2, (R,), dtype=jnp.float32)
    w2 = 0.1 * jax.random.normal(k3, (C, R), dtype=jnp.float32)   # Linear(R -> C).weight
    b2 = 0.1 * jax.random.normal(k4, (C,), dtype=jnp.float32)

    out = jax.block_until_ready(se_block(x, w1, b1, w2, b2))
    ref = jax.block_until_ready(se_block_ref(x, w1, b1, w2, b2))

    assert out.shape == (B, C, H, W)
    assert jnp.allclose(out, ref, atol=1e-5, rtol=1e-5), "mismatch vs reference"
    print("KERNEL_OK")
</pallas_src>

<mosaic_0001>
module attributes {stable_mosaic.version = 11 : i64} {
  func.func @kernel(%arg0: i32, %arg1: memref<1x4x256xf32, #tpu.memory_space<vmem>>, %arg2: memref<2x4xf32, #tpu.memory_space<vmem>>, %arg3: memref<2x1xf32, #tpu.memory_space<vmem>>, %arg4: memref<4x2xf32, #tpu.memory_space<vmem>>, %arg5: memref<4x1xf32, #tpu.memory_space<vmem>>, %arg6: memref<1x4x256xf32, #tpu.memory_space<vmem>>) attributes {dimension_semantics = [#tpu.dimension_semantics<parallel>], iteration_bounds = array<i64: 2>, scalar_prefetch = 0 : i64, scratch_operands = 0 : i64, tpu.core_type = #tpu.core_type<tc>, window_params = [{transform_indices = @transform_0, window_bounds = array<i64: 1, 4, 256>}, {pipeline_mode = #tpu.pipeline_mode<synchronous>, transform_indices = @transform_1, window_bounds = array<i64: 2, 4>}, {pipeline_mode = #tpu.pipeline_mode<synchronous>, transform_indices = @transform_2, window_bounds = array<i64: 2, 1>}, {pipeline_mode = #tpu.pipeline_mode<synchronous>, transform_indices = @transform_3, window_bounds = array<i64: 4, 2>}, {pipeline_mode = #tpu.pipeline_mode<synchronous>, transform_indices = @transform_4, window_bounds = array<i64: 4, 1>}, {transform_indices = @transform_5, window_bounds = array<i64: 1, 4, 256>}]} {
    %c0 = arith.constant 0 : index
    %c0_0 = arith.constant 0 : index
    %c0_1 = arith.constant 0 : index
    %0 = vector.load %arg1[%c0, %c0_0, %c0_1] : memref<1x4x256xf32, #tpu.memory_space<vmem>>, vector<1x4x256xf32>
    %1 = vector.shape_cast %0 : vector<1x4x256xf32> to vector<4x256xf32>
    %cst = arith.constant dense<0.000000e+00> : vector<4xf32>
    %2 = vector.multi_reduction <add>, %1, %cst [1] : vector<4x256xf32> to vector<4xf32>
    %3 = vector.shape_cast %2 : vector<4xf32> to vector<4x1xf32>
    %cst_2 = arith.constant 3.906250e-03 : f32
    %4 = vector.broadcast %cst_2 : f32 to vector<4x1xf32>
    %5 = arith.mulf %3, %4 : vector<4x1xf32>
    %c0_3 = arith.constant 0 : index
    %c0_4 = arith.constant 0 : index
    %6 = vector.load %arg2[%c0_3, %c0_4] : memref<2x4xf32, #tpu.memory_space<vmem>>, vector<2x4xf32>
    %cst_5 = arith.constant dense<0.000000e+00> : vector<2x1xf32>
    %7 = tpu.matmul %6, %5, %cst_5 {dimension_numbers = #tpu.dot_dimension_numbers<[1], [0], [0], [1], [0, 0, 1, 1], [], []>} : vector<2x4xf32>, vector<4x1xf32>, vector<2x1xf32> -> vector<2x1xf32>
    %c0_6 = arith.constant 0 : index
    %c0_7 = arith.constant 0 : index
    %8 = vector.load %arg3[%c0_6, %c0_7] : memref<2x1xf32, #tpu.memory_space<vmem>>, vector<2x1xf32>
    %9 = arith.addf %7, %8 : vector<2x1xf32>
    %cst_8 = arith.constant 0.000000e+00 : f32
    %10 = vector.broadcast %cst_8 : f32 to vector<2x1xf32>
    %11 = arith.cmpf oge, %9, %10 : vector<2x1xf32>
    %cst_9 = arith.constant 2.000000e-01 : f32
    %12 = vector.broadcast %cst_9 : f32 to vector<2x1xf32>
    %13 = arith.mulf %12, %9 : vector<2x1xf32>
    %14 = arith.select %11, %9, %13 : vector<2x1xi1>, vector<2x1xf32>
    %c0_10 = arith.constant 0 : index
    %c0_11 = arith.constant 0 : index
    %15 = vector.load %arg4[%c0_10, %c0_11] : memref<4x2xf32, #tpu.memory_space<vmem>>, vector<4x2xf32>
    %cst_12 = arith.constant dense<0.000000e+00> : vector<4x1xf32>
    %16 = tpu.matmul %15, %14, %cst_12 {dimension_numbers = #tpu.dot_dimension_numbers<[1], [0], [0], [1], [0, 0, 1, 1], [], []>} : vector<4x2xf32>, vector<2x1xf32>, vector<4x1xf32> -> vector<4x1xf32>
    %c0_13 = arith.constant 0 : index
    %c0_14 = arith.constant 0 : index
    %17 = vector.load %arg5[%c0_13, %c0_14] : memref<4x1xf32, #tpu.memory_space<vmem>>, vector<4x1xf32>
    %18 = arith.addf %16, %17 : vector<4x1xf32>
    %19 = arith.negf %18 : vector<4x1xf32>
    %20 = math.exp %19 : vector<4x1xf32>
    %cst_15 = arith.constant 1.000000e+00 : f32
    %21 = vector.broadcast %cst_15 : f32 to vector<4x1xf32>
    %22 = arith.addf %21, %20 : vector<4x1xf32>
    %23 = arith.divf %21, %22 : vector<4x1xf32>
    %24 = vector.broadcast %23 : vector<4x1xf32> to vector<4x256xf32>
    %25 = arith.mulf %1, %24 : vector<4x256xf32>
    %c0_16 = arith.constant 0 : index
    %c0_17 = arith.constant 0 : index
    %c0_18 = arith.constant 0 : index
    %26 = vector.load %arg6[%c0_16, %c0_17, %c0_18] : memref<1x4x256xf32, #tpu.memory_space<vmem>>, vector<1x4x256xf32>
    %27 = vector.shape_cast %26 : vector<1x4x256xf32> to vector<4x256xf32>
    %28 = vector.shape_cast %25 : vector<4x256xf32> to vector<1x4x256xf32>
    tpu.vector_store %arg6[%c0_16, %c0_17, %c0_18], %28 {strides = array<i32>} : memref<1x4x256xf32, #tpu.memory_space<vmem>>, vector<1x4x256xf32>,
    return
  }
  func.func @transform_0(%arg0: i32) -> (i32, i32, i32) {
    %c0_i32 = arith.constant 0 : i32
    %c0_i32_0 = arith.constant 0 : i32
    %c0_i32_1 = arith.constant 0 : i32
    return %arg0, %c0_i32, %c0_i32_0 : i32, i32, i32
  }
  func.func @transform_1(%arg0: i32) -> (i32, i32) {
    %c0_i32 = arith.constant 0 : i32
    %c0_i32_0 = arith.constant 0 : i32
    %c0_i32_1 = arith.constant 0 : i32
    return %c0_i32, %c0_i32_0 : i32, i32
  }
  func.func @transform_2(%arg0: i32) -> (i32, i32) {
    %c0_i32 = arith.constant 0 : i32
    %c0_i32_0 = arith.constant 0 : i32
    %c0_i32_1 = arith.constant 0 : i32
    return %c0_i32, %c0_i32_0 : i32, i32
  }
  func.func @transform_3(%arg0: i32) -> (i32, i32) {
    %c0_i32 = arith.constant 0 : i32
    %c0_i32_0 = arith.constant 0 : i32
    %c0_i32_1 = arith.constant 0 : i32
    return %c0_i32, %c0_i32_0 : i32, i32
  }
  func.func @transform_4(%arg0: i32) -> (i32, i32) {
    %c0_i32 = arith.constant 0 : i32
    %c0_i32_0 = arith.constant 0 : i32
    %c0_i32_1 = arith.constant 0 : i32
    return %c0_i32, %c0_i32_0 : i32, i32
  }
  func.func @transform_5(%arg0: i32) -> (i32, i32, i32) {
    %c0_i32 = arith.constant 0 : i32
    %c0_i32_0 = arith.constant 0 : i32
    %c0_i32_1 = arith.constant 0 : i32
    return %arg0, %c0_i32, %c0_i32_0 : i32, i32, i32
  }
}

</mosaic_0001>

<bundles_post_ra>
// kernel: tpu_custom_call.1
= control target key start
LH: loop header
LB: loop body
LE: loop exit
PB: predicated region body
PF: predicated region fallthrough
CT: control target
= control target key end

     0   :  { %10 = vsyncpa [#allocation3], 0  ;;  %s924_s0 = inlined_call_operand.hbm [shape: f32[2,4,256], index: 0, kind: input, shape index: {}]   ;;  %s925_s1 = inlined_call_operand.vmem [shape: f32[2,4], index: 1, kind: input, shape index: {}]   ;;  %s926_s2 = inlined_call_operand.vmem [shape: f32[2,1], index: 2, kind: input, shape index: {}]   ;;  %s927_s3 = inlined_call_operand.vmem [shape: f32[4,2], index: 3, kind: input, shape index: {}]   ;;  %s928_s4 = inlined_call_operand.vmem [shape: f32[4,1], index: 4, kind: input, shape index: {}]   ;;  %s929_s5 = inlined_call_operand.hbm [shape: f32[2,4,256], index: 5, kind: output, shape index: {}]  }
   0x1   :  { %12 = vsyncpa [#allocation3 + $0x1], 0 }
   0x2   :  { %13 = vsyncpa [#allocation4], 0 }
   0x3   :  { %15 = vsyncpa [#allocation4 + $0x1], 0  ;;  %s744_s18 = smov 0   ;;  %s746_s19 = smov 0  }
   0x4   :  { %s748_s20 = smov 0   ;;  %s750_s21 = smov 0  }
   0x5 LB: > { %s765_s22 = sadd.s32 4294967295, %s706_s21   ;;  %s519_s23 = sadd.s32 4294967294, %s706_s21   ;;  %s706_s21 = sphi %s750_s21, %s944_s21   ;;  %s702_s20 = sphi %s748_s20, %s943_s20   ;;  %s698_s19 = sphi %s746_s19, %s942_s19   ;;  %s694_s18 = sphi %s744_s18, %s941_s18  }
   0x6   : > { %s769_s24 = sadd.s32 1, %s706_s21   ;;  %s28_s25 = sadd.s32 1, %s702_s20 }
   0x7   : > { %s25_s26 = ssub.s32 %s706_s21, %s769_s24  ;;  %p35_p0 = scmp.ne.s32.totalorder %s702_s20, %s698_s19 }
   0x8   : > { %p26_p1 = scmp.eq.s32.totalorder %s25_s26, 0  ;;  %p36_p2 = scmp.eq.s32.totalorder %s706_s21, 0 }
   0x9   : > { %p41_p3 = scmp.ne.s32.totalorder %s698_s19, %s694_s18  ;;  %p42_p4 = scmp.eq.s32.totalorder %s765_s22, 0 }
   0xa   : > { %s781_s27 = scalar_select %p26_p1, %s702_s20, %s28_s25  }
   0xb   : > { %p783_p5 = por %p36_p2, %p35_p0  ;;  %p787_p6 = por %p42_p4, %p41_p3 }
   0xc   : > { %p149_p7 = scmp.eq.s32.totalorder %s765_s22, 1  ;;  %p155_p8 = scmp.eq.s32.totalorder %s519_s23, 1 }
   0xd   : > { %p566_p10 = scmp.lt.s32.totalorder %s706_s21, 2  ;;  %s187_s7 = sand.u32 1, %s702_s20  }
   0xe   : > { %p794_p11 = por %p149_p7, %p35_p0  ;;  %p798_p12 = por %p155_p8, %p41_p3 }
   0xf   : > { %s538_s8 = sshll.u32 %s706_s21, 7  ;;  %s522_s9 = sshll.u32 %s187_s7, 3 }
  0x10   : > { %s933_s30 = scalar_select %p794_p11, 1, 0 }
  0x11   : > { %s934_s6 = scalar_select %p798_p12, 1, 0 }
  0x12   : > { %s807_s12 = scalar_lea.hbm %s924_s0, %s538_s8  ;;  %s191_s13 = scalar_lea.vmem [#allocation2], %s522_s9 }
  0x13   : > { %s199_s14 = sshll.u32 %s191_s13, 4  ;;  %p811_p13 = pnand %p566_p10, %p783_p5  ;;  %s815_s14 = int_to_ptr.vmem [resolvable:$true] %s199_s14 }
  0x14   : > { %s188_s16 = scalar_lea.sflag [#allocation3], %s187_s7  ;;  %s610_s17 = scalar_lea.hbm %s807_s12, 128 }
  0x15   : > { %p611_p2 = scmp.ne.s32.totalorder %s807_s12, %s610_s17  ;;  %p612_p3 = pneg %p811_p13 }
  0x16   : > { %s615_s26 = scalar_lea.hbm %s924_s0, 256  ;;  %p616_p5 = scmp.lt.u32.totalorder %s807_s12, %s924_s0 }
  0x17   : > { %p613_p4 = pnand %p612_p3, %p611_p2  ;;  %p617_p8 = scmp.lt.u32.totalorder %s615_s26, %s610_s17 }
  0x18   : > { %p619_p9 = scmp.lt.u32.totalorder %s610_s17, %s807_s12 }
  0x19   : > { %p614_p7 = pneg %p613_p4  ;;  %p618_p10 = por %p617_p8, %p616_p5 }
  0x1b   : > { %p620_p0 = por %p619_p9, %p618_p10 }
  0x1d   : > { %p621_p1 = pnand %p620_p0, %p614_p7 }
  0x1f   : > { %624 = shalt.err (!%p621_p1)
}
  0x20   : > { %s625_s7 = scalar_lea.vmem %s815_s14, 128  ;;  %s708_s9 = smov [#allocation2]  }
  0x21   : > { %p626_p2 = scmp.ne.s32.totalorder %s815_s14, %s625_s7  ;;  %s630_s10 = sshll.u32 %s708_s9, 4  ;;  %s631_s10 = int_to_ptr.vmem [resolvable:$false] %s630_s10 }
  0x22   : > { %s632_s11 = scalar_lea.vmem %s631_s10, 256  ;;  %p633_p11 = scmp.lt.s32.totalorder %s815_s14, %s631_s10 }
  0x23   : > { %p628_p4 = pnand %p626_p2, %p612_p3  ;;  %p634_p5 = scmp.lt.s32.totalorder %s632_s11, %s625_s7 }
  0x25   : > { %p629_p12 = pneg %p628_p4  ;;  %p635_p8 = por %p634_p5, %p633_p11 }
  0x27   : > { %p636_p9 = pnand %p635_p8, %p629_p12 }
  0x29   : > { %639 = shalt.err (!%p636_p9)
}
  0x2a   : > { %561 = dma.hbm_to_vmem [thread:$0]  (!%p811_p13), %s807_s12, 128, %s815_s14, %s188_s16  }
  0x2b   : > { %p936_p0 = scmp.lt.s32.totalorder %s706_s21, 3  ;;  %p937_p1 = scmp.ge.s32.totalorder %s706_s21, 1 }
  0x2d   : > { %p205_p3 = pnand %p937_p1, %p936_p0 }
  0x2e   : > { %s849_s13 = sand.u32 (!%p205_p3), 1, %s698_s19  }
  0x2f   : > { %208 = sbr.rel (%p205_p3) target bundleno = 810 (0x32a), region = 40  ;;  %s526_s17 = sshll.u32 (!%p205_p3), %s849_s13, 3 }
  0x30   : > { %s211_s23 = scalar_lea.sflag (!%p205_p3), [#allocation3], %s849_s13  ;;  %s214_s15 = scalar_lea.vmem (!%p205_p3), [#allocation2], %s526_s17 }
  0x36   : > { %685 = dma.done.wait (%p787_p6), %s211_s23, 128  }
  0x37   : > { %687 = vsyncadd (%p787_p6), %s211_s23, 4294967168  ;;  %vm245_vm0 = vcmask 1043456   ;;  %v241_v0 = vld [vmem:[%s214_s15] sm:$0xff]  ;;  %v709_v5 = vmov 0.0   ;;  %vm710_vm1 = vmmov 0   ;;  %vm254_vm2 = vcmask 31744  }
  0x38   : > { %v243_v1 = vcombine.high %v241_v0, %v241_v0  ;;  %v246_v2 = vsel %vm245_vm0, %v241_v0, 0.0  ;;  %544 = vmatprep.subr.mxu0 %v709_v5  ;;  %549 = vmatprep.subr.mxu1 %v709_v5  ;;  %v252_v8 = vld [vmem:[%s925_s1] sm:$0x3]  ;;  %vm340_vm4 = vcmask 1041408   ;;  %vm336_vm5 = vcmask 15360   ;;  %s539_s7 = sshll.u32 %s765_s22, 7 }
  0x39   : > { %546 = vmatprep.mubr.msk.f32.mxu0 %vm710_vm1, %v709_v5  ;;  %551 = vmatprep.mubr.msk.f32.mxu1 %vm710_vm1, %v709_v5  ;;  %v253_v9 = vld [vmem:[%s926_s2] sm:$0x3]  ;;  %v711_v16 = vmov 0   ;;  %v712_v25 = vmov 839922192   ;;  %v427_v27 = vlaneseq  ;;  %s240_s9 = scalar_lea.vmem [#allocation5], %s526_s17  ;;  %s880_s15 = scalar_lea.hbm %s929_s5, %s539_s7 }
  0x3a   : > { %v247_v3 = vsel %vm245_vm0, %v243_v1, 0.0  ;;  %v334_v14 = vld [vmem:[%s927_s3] sm:$0xf]  ;;  %604 = vset.pattern.permute.xlu0 %v711_v16  ;;  %v425_v26 = vunpack.c.l.s4 %v712_v25  ;;  %s449_s10 = sshll.u32 %s240_s9, 4  ;;  %s435_s12 = scalar_lea.sflag [#allocation4], %s849_s13  ;;  %s882_s10 = int_to_ptr.vmem [resolvable:$true] %s449_s10 }
  0x3b   : > { %v248_v4 = vadd.f32 %v247_v3, %v246_v2  ;;  %v335_v17 = vld [vmem:[%s928_s4] sm:$0xf]  ;;  %v428_v29 = vshrl.u32 %v427_v27, 7  ;;  %s640_s29 = scalar_lea.vmem %s882_s10, 128  ;;  %p938_p11 = scmp.ne.s32.totalorder %s933_s30, 0 }
  0x3c   : > { %v426_v28 = vunpack.c.0.s8 %v425_v26  ;;  %p641_p6 = scmp.ne.s32.totalorder %s882_s10, %s640_s29  ;;  %s713_s22 = smov [#allocation5]  }
  0x3d   : > { %249 = vadd.xlane.f32.xlu0 %v248_v4  ;;  %s644_s17 = sshll.u32 %s713_s22, 4  ;;  %s645_s17 = int_to_ptr.vmem [resolvable:$false] %s644_s17 }
  0x3e   : > { %v429_v30 = vsub.s32 %v426_v28, %v428_v29  ;;  %p642_p12 = pnand %p641_p6, %p938_p11  ;;  %s646_s14 = scalar_lea.vmem %s645_s17, 256 }
  0x3f   : > { %p647_p7 = scmp.lt.s32.totalorder %s882_s10, %s645_s17  ;;  %p648_p10 = scmp.lt.s32.totalorder %s646_s14, %s640_s29 }
  0x40   : > { %p643_p13 = pneg %p642_p12 }
  0x41   : > { %p649_p2 = por %p648_p10, %p647_p7 }
  0x43   : > { %p650_p4 = pnand %p649_p2, %p643_p13 }
  0xca   : > { %v250_v6 = vpop.xlane.xlu0 %249 }
  0xcb   : > { %v251_v7 = vmul.f32 0.00390625, %v250_v6 }
  0xcd   : > { %545 = vmatpush3.msk.msra.mxu0 %vm245_vm0, %v251_v7 }
  0xce   : > { %547 = vmatmul.mubr.msk.f32.vlgmr.msra.gmra.mrb[0].mxu0 %vm254_vm2, %v252_v8 }
 0x1a1   : > { %v327_v10 = vpop.f32.mrb[0].mxu0 }
 0x1a2   : > { %v328_v11 = vadd.f32 %v327_v10, %v253_v9  ;;  %v548_v12 = vpop.f32.mrb[1].mxu0 }
 0x1a4   : > { %v332_v13 = vmul.f32 0.2, %v328_v11  ;;  %vm331_vm3 = vcmp.ge.f32.partialorder %v328_v11, 0.0 }
 0x1a6   : > { %v333_v15 = vsel %vm331_vm3, %v328_v11, %v332_v13 }
 0x1a7   : > { %550 = vmatpush3.msk.msra.mxu1 %vm340_vm4, %v333_v15 }
 0x1a8   : > { %552 = vmatmul.mubr.msk.f32.vlgmr.msra.gmra.mrb[0].mxu1 %vm336_vm5, %v334_v14 }
 0x27b   : > { %v410_v18 = vpop.f32.mrb[0].mxu1 }
 0x27c   : > { %v411_v19 = vadd.f32 %v410_v18, %v335_v17  ;;  %v553_v20 = vpop.f32.mrb[1].mxu1 }
 0x27e   : > { %v532_v21 = vmul.f32 -1.442695, %v411_v19 }
 0x280   : > { %606 = vpow2.f32 %v532_v21 }
 0x28a   : > { %v607_v22 = vpop.eup %606 }
 0x28b   : > { %v417_v23 = vadd.f32 1.0, %v607_v22 }
 0x28d   : > { %608 = vrcp.f32 %v417_v23 }
 0x297   : > { %v609_v24 = vpop.eup %608 }
 0x298   : > { %422 = vperm.xlu0 %604, %v609_v24  }
 0x317   : > { %v423_v31 = vpop.permute.xlu0 %422 }
 0x318   : > { %v430_v32 = vrot.slane %v423_v31, %v429_v30 }
 0x31a   : > { %v432_v33 = vmul.f32 %v430_v32, %v241_v0 }
 0x31c   : > { %433 = vst [vmem:[%s240_s9] sm:$0xff] %v432_v33 }
 0x31d   : > { %653 = shalt.err (!%p650_p4)
}
 0x31e   : > { %s654_s13 = scalar_lea.hbm %s880_s15, 128  ;;  %s658_s26 = scalar_lea.hbm %s929_s5, 256 }
 0x31f   : > { %p655_p5 = scmp.ne.s32.totalorder %s880_s15, %s654_s13  ;;  %p659_p0 = scmp.lt.u32.totalorder %s880_s15, %s929_s5 }
 0x320   : > { %p660_p1 = scmp.lt.u32.totalorder %s658_s26, %s654_s13  ;;  %p662_p6 = scmp.lt.u32.totalorder %s654_s13, %s880_s15 }
 0x321   : > { %p656_p8 = pnand %p655_p5, %p938_p11 }
 0x322   : > { %p661_p3 = por %p660_p1, %p659_p0 }
 0x323   : > { %p657_p9 = pneg %p656_p8 }
 0x324   : > { %p663_p12 = por %p662_p6, %p661_p3 }
 0x326   : > { %p664_p13 = pnand %p663_p12, %p657_p9 }
 0x328   : > { %667 = shalt.err (!%p664_p13)
}
 0x329   : > { %556 = dma.vmem_to_hbm [thread:$0]  (%p938_p11), %s882_s10, 128, %s880_s15, %s435_s12  }
 0x32a PF: > { %s461_s7 = sand.u32 1, %s694_s18   ;;  %p939_p7 = scmp.ne.s32.totalorder %s934_s6, 0 }
 0x32b   : > { %p940_p10 = scmp.ge.s32.totalorder %s706_s21, 2  ;;  %s462_s9 = scalar_lea.sflag [#allocation4], %s461_s7 }
 0x32d   : > { %p563_p2 = pnand %p940_p10, %p939_p7 }
 0x32f   : > { %689 = dma.done.wait (!%p563_p2), %s462_s9, 128  }
 0x330   : > { %691 = vsyncadd (!%p563_p2), %s462_s9, 4294967168  ;;  %p18_p4 = scmp.ge.s32.totalorder %s769_s24, 4   ;;  %s941_s18 = smov %s698_s19 }
 0x331   : > { %s942_s19 = smov %s702_s20  ;;  %s943_s20 = smov %s781_s27 }
 0x332   : > { %s944_s21 = smov %s769_s24  ;;  %20 = sbr.rel (!%p18_p4) target bundleno = 5 (0x5), region = 85 }
 0x339   :  { %467 = vsyncpa [#allocation3], 1 }
 0x33a   :  { %469 = vsyncpa [#allocation3 + $0x1], 1 }
 0x33b   :  { %470 = vsyncpa [#allocation4], 1 }
 0x33c   :  { %472 = vsyncpa [#allocation4 + $0x1], 1 }

</bundles_post_ra>
